<compile_context>
chip_gen: v6e
topology: v6e:2x2x1
jax: 0.10.0
libtpu: 0.0.40
codegen_flags: <defaults>
</compile_context>

<pallas_src>
import functools

import jax
import jax.numpy as jnp
import numpy as np
from jax.experimental import pallas as pl
from jax.experimental.pallas import tpu as pltpu


def _attention_kernel(x_ref, wqkv_ref, wout_ref, o_ref, *, bt, n, dim, dim_head, scale):
    # x_ref:    (Bt, N, DIM)            bf16
    # wqkv_ref: (1, DIM, 3*dim_head)    bf16   (per-head [q|k|v] columns)
    # wout_ref: (1, dim_head, DIM)      bf16   (per-head rows of W_out)
    # o_ref:    (Bt, N, DIM)            f32    (resident accumulator over heads)
    h = pl.program_id(1)

    x = x_ref[...].reshape(bt * n, dim)                       # (Bt*N, DIM) bf16
    w_qkv_h = wqkv_ref[0]                                     # (DIM, 3*D)  bf16

    # Per-head QKV projection (MXU, bf16 operands, f32 accumulate).
    qkv = jnp.dot(x, w_qkv_h, preferred_element_type=jnp.float32)   # (Bt*N, 3*D) f32

    # Fold the softmax scale into q (O(N*D) instead of O(N*N)).
    q = (qkv[:, :dim_head] * scale).reshape(bt, n, dim_head)
    k = qkv[:, dim_head:2 * dim_head].reshape(bt, n, dim_head)
    v = qkv[:, 2 * dim_head:].reshape(bt, n, dim_head)

    # Scores: contract the last dim of both q and k (no explicit kh.T relayout).
    dots = jnp.einsum(
        "bnd,bmd->bnm",
        q.astype(jnp.bfloat16), k.astype(jnp.bfloat16),
        preferred_element_type=jnp.float32,
    )                                                          # (Bt, N, N) f32

    # Numerically-stable softmax numerator; keep elementwise math in f32.
    m = jnp.max(dots, axis=-1, keepdims=True)
    e = jnp.exp(dots - m)                                      # (Bt, N, N) f32
    denom = jnp.sum(e, axis=-1, keepdims=True)                 # (Bt, N, 1) f32

    # PV matmul on the un-normalized probabilities; normalize afterwards
    # (O(N*D) multiplies instead of O(N*N)); approx reciprocal goes to the EUP.
    pv = jnp.einsum(
        "bnm,bmd->bnd",
        e.astype(jnp.bfloat16), v.astype(jnp.bfloat16),
        preferred_element_type=jnp.float32,
    )                                                          # (Bt, N, D) f32
    out_h = pv * pl.reciprocal(denom, approx=True)             # (Bt, N, D) f32

    # Per-head slice of the output projection, accumulated into the resident output.
    contrib = jnp.dot(
        out_h.reshape(bt * n, dim_head).astype(jnp.bfloat16),
        wout_ref[0],
        preferred_element_type=jnp.float32,
    ).reshape(bt, n, dim)                                      # (Bt, N, DIM) f32

    @pl.when(h == 0)
    def _():
        o_ref[...] = jnp.zeros_like(o_ref)

    o_ref[...] += contrib


def _pick_batch_tile(B, N, target_m=256):
    """Largest divisor of B such that Bt*N ~ target_m (fills the MXU M dim)."""
    bt = max(1, min(B, -(-target_m // N)))
    while B % bt:
        bt -= 1
    return bt


def attention(x, w_qkv, w_out, *, heads, dim_head, batch_tile=None):
    """Multi-head self-attention.  x: (B, N, DIM) -> (B, N, DIM) in f32.

    w_qkv: (DIM, 3*inner) in x @ W layout, columns ordered [q | k | v], each with
           feature index h*dim_head + d (matches PyTorch's 'b n (h d)' rearrange).
    w_out: (inner, DIM) in x @ W layout.
    """
    B, N, DIM = x.shape
    inner = heads * dim_head
    assert w_qkv.shape == (DIM, 3 * inner)
    assert w_out.shape == (inner, DIM)
    scale = dim_head ** (-0.5)

    bt = batch_tile or _pick_batch_tile(B, N)

    # Re-layout weights per head (wrapper-side layout plumbing, outside the kernel):
    #   w_qkv_h: (heads, DIM, 3*dim_head) with per-head columns [q_h | k_h | v_h]
    #   w_out_h: (heads, dim_head, DIM)
    wq, wk, wv = jnp.split(w_qkv, 3, axis=1)

    def per_head(w):  # (DIM, inner) -> (heads, DIM, dim_head)
        return w.reshape(DIM, heads, dim_head).transpose(1, 0, 2)

    w_qkv_h = jnp.concatenate([per_head(wq), per_head(wk), per_head(wv)], axis=-1)
    w_out_h = w_out.reshape(heads, dim_head, DIM)

    # bf16 MXU operands (f32 accumulation happens inside the kernel).
    x_bf = x.astype(jnp.bfloat16)
    w_qkv_h = w_qkv_h.astype(jnp.bfloat16)
    w_out_h = w_out_h.astype(jnp.bfloat16)

    kernel = functools.partial(
        _attention_kernel, bt=bt, n=N, dim=DIM, dim_head=dim_head, scale=scale
    )

    return pl.pallas_call(
        kernel,
        out_shape=jax.ShapeDtypeStruct((B, N, DIM), jnp.float32),
        grid=(B // bt, heads),
        in_specs=[
            pl.BlockSpec((bt, N, DIM), lambda b, h: (b, 0, 0)),            # x batch tile
            pl.BlockSpec((1, DIM, 3 * dim_head), lambda b, h: (h, 0, 0)),  # per-head qkv W
            pl.BlockSpec((1, dim_head, DIM), lambda b, h: (h, 0, 0)),      # per-head out W
        ],
        out_specs=pl.BlockSpec((bt, N, DIM), lambda b, h: (b, 0, 0)),      # resident over h
        compiler_params=pltpu.CompilerParams(
            dimension_semantics=("parallel", "arbitrary"),
        ),
    )(x_bf, w_qkv_h, w_out_h)


def _reference(x, w_qkv, w_out, *, heads, dim_head):
    """Pure-JAX f32 reference matching the PyTorch forward."""
    B, N, DIM = x.shape
    inner = heads * dim_head
    scale = dim_head ** (-0.5)
    qkv = x @ w_qkv
    q, k, v = jnp.split(qkv, 3, axis=-1)

    def to_heads(t):  # 'b n (h d) -> b h n d'
        return t.reshape(B, N, heads, dim_head).transpose(0, 2, 1, 3)

    q, k, v = map(to_heads, (q, k, v))
    dots = jnp.einsum("bhid,bhjd->bhij", q, k) * scale
    attn = jax.nn.softmax(dots, axis=-1)
    out = jnp.einsum("bhij,bhjd->bhid", attn, v)
    out = out.transpose(0, 2, 1, 3).reshape(B, N, inner)
    return out @ w_out


if __name__ == "__main__":
    key = jax.random.PRNGKey(0)
    B, N, DIM = 2, 8, 32
    HEADS, DIM_HEAD = 8, 64
    INNER = HEADS * DIM_HEAD

    kx, kq, ko = jax.random.split(key, 3)
    x = jax.random.normal(kx, (B, N, DIM), dtype=jnp.float32)
    # Deterministic synthetic parameters (nn.Linear-like fan-in scaling, no bias).
    w_qkv = jax.random.normal(kq, (DIM, 3 * INNER), dtype=jnp.float32) * (DIM ** -0.5)
    w_out = jax.random.normal(ko, (INNER, DIM), dtype=jnp.float32) * (INNER ** -0.5)

    out = attention(x, w_qkv, w_out, heads=HEADS, dim_head=DIM_HEAD)
    out = jax.block_until_ready(out)

    ref = _reference(x, w_qkv, w_out, heads=HEADS, dim_head=DIM_HEAD)
    # Tolerance reflects bf16 MXU operands (f32 accumulation) vs. the pure-f32 reference.
    np.testing.assert_allclose(np.asarray(out), np.asarray(ref), rtol=2e-2, atol=2e-2)

    print("KERNEL_OK")
</pallas_src>

<mosaic_0001>
module attributes {stable_mosaic.version = 11 : i64} {
  func.func @_attention_kernel(%arg0: i32, %arg1: i32, %arg2: memref<2x8x32xbf16, #tpu.memory_space<vmem>>, %arg3: memref<1x32x192xbf16, #tpu.memory_space<vmem>>, %arg4: memref<1x64x32xbf16, #tpu.memory_space<vmem>>, %arg5: memref<2x8x32xf32, #tpu.memory_space<vmem>>) attributes {dimension_semantics = [#tpu.dimension_semantics<parallel>, #tpu.dimension_semantics<arbitrary>], iteration_bounds = array<i64: 1, 8>, scalar_prefetch = 0 : i64, scratch_operands = 0 : i64, tpu.core_type = #tpu.core_type<tc>, window_params = [{transform_indices = @transform_0, window_bounds = array<i64: 2, 8, 32>}, {transform_indices = @transform_1, window_bounds = array<i64: 1, 32, 192>}, {transform_indices = @transform_2, window_bounds = array<i64: 1, 64, 32>}, {transform_indices = @transform_3, window_bounds = array<i64: 2, 8, 32>}]} {
    %c0 = arith.constant 0 : index
    %c0_0 = arith.constant 0 : index
    %c0_1 = arith.constant 0 : index
    %0 = vector.load %arg2[%c0, %c0_0, %c0_1] : memref<2x8x32xbf16, #tpu.memory_space<vmem>>, vector<2x8x32xbf16>
    %1 = vector.shape_cast %0 : vector<2x8x32xbf16> to vector<16x32xbf16>
    %c0_2 = arith.constant 0 : index
    %c0_3 = arith.constant 0 : index
    %c0_4 = arith.constant 0 : index
    %2 = vector.load %arg3[%c0_2, %c0_3, %c0_4] : memref<1x32x192xbf16, #tpu.memory_space<vmem>>, vector<1x32x192xbf16>
    %3 = vector.shape_cast %2 : vector<1x32x192xbf16> to vector<32x192xbf16>
    %cst = arith.constant dense<0.000000e+00> : vector<16x192xf32>
    %4 = tpu.matmul %1, %3, %cst {dimension_numbers = #tpu.dot_dimension_numbers<[1], [0], [0], [1], [0, 0, 1, 1], [], []>} : vector<16x32xbf16>, vector<32x192xbf16>, vector<16x192xf32> -> vector<16x192xf32>
    %5 = vector.extract_strided_slice %4 {offsets = [0, 0], sizes = [16, 64], strides = [1, 1]} : vector<16x192xf32> to vector<16x64xf32>
    %cst_5 = arith.constant 1.250000e-01 : f32
    %6 = vector.broadcast %cst_5 : f32 to vector<16x64xf32>
    %7 = arith.mulf %5, %6 : vector<16x64xf32>
    %8 = vector.shape_cast %7 : vector<16x64xf32> to vector<2x8x64xf32>
    %9 = vector.extract_strided_slice %4 {offsets = [0, 64], sizes = [16, 64], strides = [1, 1]} : vector<16x192xf32> to vector<16x64xf32>
    %10 = vector.shape_cast %9 : vector<16x64xf32> to vector<2x8x64xf32>
    %11 = vector.extract_strided_slice %4 {offsets = [0, 128], sizes = [16, 64], strides = [1, 1]} : vector<16x192xf32> to vector<16x64xf32>
    %12 = vector.shape_cast %11 : vector<16x64xf32> to vector<2x8x64xf32>
    %13 = arith.truncf %8 : vector<2x8x64xf32> to vector<2x8x64xbf16>
    %14 = arith.truncf %10 : vector<2x8x64xf32> to vector<2x8x64xbf16>
    "tpu.trace_start"() <{level = 10 : i32, message = "bnd,bmd->bnm"}> : () -> ()
    %cst_6 = arith.constant dense<0.000000e+00> : vector<2x8x8xf32>
    %15 = tpu.matmul %13, %14, %cst_6 {dimension_numbers = #tpu.dot_dimension_numbers<[2], [2], [1], [1], [0, 0, 0, 1, 1, 1], [0], [0]>} : vector<2x8x64xbf16>, vector<2x8x64xbf16>, vector<2x8x8xf32> -> vector<2x8x8xf32>
    "tpu.trace_stop"() : () -> ()
    %cst_7 = arith.constant dense<0xFF800000> : vector<2x8xf32>
    %16 = vector.multi_reduction <maximumf>, %15, %cst_7 [2] : vector<2x8x8xf32> to vector<2x8xf32>
    %17 = vector.shape_cast %16 : vector<2x8xf32> to vector<2x8x1xf32>
    %18 = vector.broadcast %17 : vector<2x8x1xf32> to vector<2x8x8xf32>
    %19 = arith.subf %15, %18 : vector<2x8x8xf32>
    %20 = math.exp %19 : vector<2x8x8xf32>
    %cst_8 = arith.constant dense<0.000000e+00> : vector<2x8xf32>
    %21 = vector.multi_reduction <add>, %20, %cst_8 [2] : vector<2x8x8xf32> to vector<2x8xf32>
    %22 = vector.shape_cast %21 : vector<2x8xf32> to vector<2x8x1xf32>
    %23 = arith.truncf %20 : vector<2x8x8xf32> to vector<2x8x8xbf16>
    %24 = arith.truncf %12 : vector<2x8x64xf32> to vector<2x8x64xbf16>
    "tpu.trace_start"() <{level = 10 : i32, message = "bnm,bmd->bnd"}> : () -> ()
    %cst_9 = arith.constant dense<0.000000e+00> : vector<2x8x64xf32>
    %25 = tpu.matmul %23, %24, %cst_9 {dimension_numbers = #tpu.dot_dimension_numbers<[2], [1], [1], [2], [0, 0, 0, 1, 1, 2], [0], [0]>} : vector<2x8x8xbf16>, vector<2x8x64xbf16>, vector<2x8x64xf32> -> vector<2x8x64xf32>
    "tpu.trace_stop"() : () -> ()
    %26 = tpu.reciprocal %22 {approx = true} : vector<2x8x1xf32> -> vector<2x8x1xf32>
    %27 = vector.broadcast %26 : vector<2x8x1xf32> to vector<2x8x64xf32>
    %28 = arith.mulf %25, %27 : vector<2x8x64xf32>
    %29 = vector.shape_cast %28 : vector<2x8x64xf32> to vector<16x64xf32>
    %30 = arith.truncf %29 : vector<16x64xf32> to vector<16x64xbf16>
    %c0_10 = arith.constant 0 : index
    %c0_11 = arith.constant 0 : index
    %c0_12 = arith.constant 0 : index
    %31 = vector.load %arg4[%c0_10, %c0_11, %c0_12] : memref<1x64x32xbf16, #tpu.memory_space<vmem>>, vector<1x64x32xbf16>
    %32 = vector.shape_cast %31 : vector<1x64x32xbf16> to vector<64x32xbf16>
    %cst_13 = arith.constant dense<0.000000e+00> : vector<16x32xf32>
    %33 = tpu.matmul %30, %32, %cst_13 {dimension_numbers = #tpu.dot_dimension_numbers<[1], [0], [0], [1], [0, 0, 1, 1], [], []>} : vector<16x64xbf16>, vector<64x32xbf16>, vector<16x32xf32> -> vector<16x32xf32>
    %34 = vector.shape_cast %33 : vector<16x32xf32> to vector<2x8x32xf32>
    %c0_i32 = arith.constant 0 : i32
    %35 = arith.cmpi eq, %arg1, %c0_i32 : i32
    %36 = arith.extui %35 : i1 to i32
    %c0_i32_14 = arith.constant 0 : i32
    %37 = arith.cmpi ne, %36, %c0_i32_14 : i32
    scf.if %37 {
      %cst_21 = arith.constant 0.000000e+00 : f32
      %41 = vector.broadcast %cst_21 : f32 to vector<2x8x32xf32>
      %c0_22 = arith.constant 0 : index
      %c0_23 = arith.constant 0 : index
      %c0_24 = arith.constant 0 : index
      %42 = vector.load %arg5[%c0_22, %c0_23, %c0_24] : memref<2x8x32xf32, #tpu.memory_space<vmem>>, vector<2x8x32xf32>
      tpu.vector_store %arg5[%c0_22, %c0_23, %c0_24], %41 {strides = array<i32>} : memref<2x8x32xf32, #tpu.memory_space<vmem>>, vector<2x8x32xf32>,
    } else {
    }
    %c0_15 = arith.constant 0 : index
    %c0_16 = arith.constant 0 : index
    %c0_17 = arith.constant 0 : index
    %38 = vector.load %arg5[%c0_15, %c0_16, %c0_17] : memref<2x8x32xf32, #tpu.memory_space<vmem>>, vector<2x8x32xf32>
    %39 = arith.addf %38, %34 : vector<2x8x32xf32>
    %c0_18 = arith.constant 0 : index
    %c0_19 = arith.constant 0 : index
    %c0_20 = arith.constant 0 : index
    %40 = vector.load %arg5[%c0_18, %c0_19, %c0_20] : memref<2x8x32xf32, #tpu.memory_space<vmem>>, vector<2x8x32xf32>
    tpu.vector_store %arg5[%c0_18, %c0_19, %c0_20], %39 {strides = array<i32>} : memref<2x8x32xf32, #tpu.memory_space<vmem>>, vector<2x8x32xf32>,
    return
  }
  func.func @transform_0(%arg0: i32, %arg1: i32) -> (i32, i32, i32) {
    %c0_i32 = arith.constant 0 : i32
    %c0_i32_0 = arith.constant 0 : i32
    %c0_i32_1 = arith.constant 0 : i32
    return %arg0, %c0_i32, %c0_i32_0 : i32, i32, i32
  }
  func.func @transform_1(%arg0: i32, %arg1: i32) -> (i32, i32, i32) {
    %c0_i32 = arith.constant 0 : i32
    %c0_i32_0 = arith.constant 0 : i32
    %c0_i32_1 = arith.constant 0 : i32
    return %arg1, %c0_i32, %c0_i32_0 : i32, i32, i32
  }
  func.func @transform_2(%arg0: i32, %arg1: i32) -> (i32, i32, i32) {
    %c0_i32 = arith.constant 0 : i32
    %c0_i32_0 = arith.constant 0 : i32
    %c0_i32_1 = arith.constant 0 : i32
    return %arg1, %c0_i32, %c0_i32_0 : i32, i32, i32
  }
  func.func @transform_3(%arg0: i32, %arg1: i32) -> (i32, i32, i32) {
    %c0_i32 = arith.constant 0 : i32
    %c0_i32_0 = arith.constant 0 : i32
    %c0_i32_1 = arith.constant 0 : i32
    return %arg0, %c0_i32, %c0_i32_0 : i32, i32, i32
  }
}

</mosaic_0001>

<bundles_post_ra>
// kernel: tpu_custom_call.1
= control target key start
LH: loop header
LB: loop body
LE: loop exit
PB: predicated region body
PF: predicated region fallthrough
CT: control target
= control target key end

     0   :  { %8 = vsyncpa [#allocation3], 0  ;;  %s916_s12 = smov 0   ;;  %s918_s13 = smov 0   ;;  %s1015_s0 = inlined_call_operand.vmem [shape: bf16[2,8,32], index: 0, kind: input, shape index: {}]   ;;  %s1016_s1 = inlined_call_operand.vmem [shape: bf16[8,32,192], index: 1, kind: input, shape index: {}]   ;;  %s1017_s2 = inlined_call_operand.vmem [shape: bf16[8,64,32], index: 2, kind: input, shape index: {}]   ;;  %s1018_s3 = inlined_call_operand.hbm [shape: f32[2,8,32], index: 3, kind: output, shape index: {}]  }
   0x1   :  { %s920_s14 = smov 0  }
   0x2 LB: > { %s699_s15 = sadd.s32 4294967295, %s886_s14   ;;  %s23_s16 = sadd.s32 1, %s882_s13  ;;  %s886_s14 = sphi %s920_s14, %s14_s14   ;;  %s882_s13 = sphi %s918_s13, %s1021_s13   ;;  %s878_s12 = sphi %s916_s12, %s1020_s12  }
   0x3   : > { %p24_p0 = scmp.ge.s32.totalorder %s23_s16, 8  ;;  %p703_p1 = scmp.ge.s32.totalorder %s886_s14, 1 }
   0x4   : > { %p171_p2 = scmp.lt.s32.totalorder %s886_s14, 9 }
   0x5   : > { %s1023_s16 = smov (%p24_p0, %s23_s16), 0 }
   0x6   : > { %p172_p3 = pnand %p703_p1, %p171_p2 }
   0x7   : > { %p206_p4 = scmp.lt.s32.totalorder (!%p172_p3), %s878_s12, 7  ;;  %s891_s27 = smov (!%p172_p3), 64  }
   0x8   : > { %175 = sbr.rel (%p172_p3) target bundleno = 1114 (0x45a), region = 32  ;;  %p723_p5 = scmp.ne.s32.totalorder (!%p172_p3), %s878_s12, 0 }
   0xd   : > { %v888_v0 = vmov 0   ;;  %s207_s17 = scalar_select %p206_p4, %s878_s12, 7  ;;  %v823_v5 = vld [vmem:[%s1015_s0] sm:$0xff]   ;;  %vm249_vm0 = vcmask 261120   ;;  %v889_v6 = vmov 0.0   ;;  %vm890_vm1 = vmmov 0  }
   0xe   : > { %285 = vmatprep.mubr.bf16.mxu0 %v888_v0  ;;  %743 = vmatprep.subr.bf16.mxu1 %v889_v6  ;;  %vm305_vm2 = vcmask 523264   ;;  %vm427_vm3 = vcmask 1043456   ;;  %vm401_vm4 = vcmask 64512  }
   0xf   : > { %s728_s18 = sshll.u32 %s207_s17, 5  ;;  %745 = vmatprep.mubr.msk.bf16.mxu1 %vm890_vm1, %v889_v6 }
  0x10   : > { %s210_s21 = scalar_lea.vmem %s1016_s1, %s728_s18  ;;  %s945_s24 = scalar_lea.vmem %s1017_s2, %s728_s18 }
  0x11   : > { %v817_v1 = vld [vmem:[%s210_s21 + $0x14] ss:$8 sps:$4 sm:$0xff]   ;;  %v819_v2 = vld [vmem:[%s210_s21 + $0x10] ss:$8 sps:$4 sm:$0xff]   ;;  %v820_v3 = vld [vmem:[%s210_s21 + $0x4] ss:$8 sps:$4 sm:$0xff]  }
  0x12   : > { %265 = vmatprep.subr.bf16.mxu0 %v817_v1  ;;  %v822_v4 = vld [vmem:[%s210_s21] ss:$8 sps:$4 sm:$0xff]   ;;  %v824_v47 = vld [vmem:[%s945_s24 + $0x18] sm:$0xff]   ;;  %v825_v48 = vld [vmem:[%s945_s24 + $0x10] sm:$0xff]  }
  0x13   : > { %266 = vmatpush1.bf16.msra.mxu0 %v819_v2  ;;  %v826_v49 = vld [vmem:[%s945_s24 + $0x8] sm:$0xff]   ;;  %v827_v50 = vld [vmem:[%s945_s24] sm:$0xff]  }
  0x14   : > { %267 = vmatprep.subr.bf16.mxu0 %v820_v3 }
  0x17   : > { %268 = vmatpush1.bf16.msra.mxu0 %v822_v4 }
  0x18   : > { %749 = vmatprep.subr.bf16.mxu0 %v889_v6 }
  0x1a   : > { %713 = vmatmul.mubr.msk.bf16.vlgmr.msra.gmra.mxu0 %vm249_vm0, %v823_v5 }
  0x1b   : > { %751 = vmatprep.mubr.msk.bf16.mxu0 %vm890_vm1, %v889_v6 }
  0xda   : > { %v287_v7 = vpop.f32.mrf.mxu0 }
  0xdb   : > { %v300_v8 = vpack.c.bf16 %v287_v7, %v287_v7  ;;  %v296_v14 = vmul.f32 0.125, %v287_v7 }
  0xdc   : > { %v289_v9 = vpop.f32.mrf.mxu0 }
  0xdd   : > { %303 = vrot.lane.b32.xlu0 %v300_v8, %s891_s27  ;;  %v422_v16 = vpack.c.bf16 %v289_v9, %v289_v9  ;;  %v298_v19 = vpack.c.bf16 %v296_v14, %v296_v14 }
  0xde   : > { %v291_v10 = vpop.f32.mrf.mxu0 }
  0xdf   : > { %v301_v11 = vpack.c.bf16 %v291_v10, %v291_v10  ;;  %v297_v20 = vmul.f32 0.125, %v291_v10  ;;  %v429_v21 = vsel %vm427_vm3, %v422_v16, 0 }
  0xe0   : > { %v293_v18 = vpop.f32.mrf.mxu0 }
  0xe1   : > { %353 = vrot.lane.b32.xlu0 %v301_v11, %s891_s27  ;;  %v423_v22 = vpack.c.bf16 %v293_v18, %v293_v18  ;;  %v299_v23 = vpack.c.bf16 %v297_v20, %v297_v20 }
  0xe3   : > { %v475_v24 = vsel %vm427_vm3, %v423_v22, 0 }
 0x14f   : > { %v304_v12 = vpop.permute.xlu0 %303 }
 0x150   : > { %v310_v13 = vsel %vm305_vm2, %v304_v12, 0 }
 0x151   : > { %744 = vmatpush3.bf16.xpose.msra.mxu1 %v310_v13 }
 0x152   : > { %755 = vmatprep.subr.bf16.mxu1 %v889_v6 }
 0x153   : > { %v354_v15 = vpop.permute.xlu0 %353 }
 0x154   : > { %v359_v17 = vsel %vm305_vm2, %v354_v15, 0 }
 0x155   : > { %750 = vmatpush3.bf16.xpose.msra.mxu0 %v359_v17 }
 0x156   : > { %761 = vmatprep.subr.bf16.mxu0 %v889_v6 }
 0x158   : > { %746 = vmatmul.mubr.msk.bf16.vlgmr.msra.gmra.mxu1 %vm305_vm2, %v298_v19 }
 0x159   : > { %756 = vmatpush3.bf16.msra.mxu1 %v429_v21  ;;  %757 = vmatprep.mubr.msk.bf16.mxu1 %vm890_vm1, %v889_v6 }
 0x15a   : > { %767 = vmatprep.subr.bf16.mxu1 %v889_v6 }
 0x15c   : > { %752 = vmatmul.mubr.msk.bf16.vlgmr.msra.gmra.mxu0 %vm305_vm2, %v299_v23 }
 0x15d   : > { %762 = vmatpush3.bf16.msra.mxu0 %v475_v24  ;;  %763 = vmatprep.mubr.msk.bf16.mxu0 %vm890_vm1, %v889_v6 }
 0x218   : > { %v346_v25 = vpop.f32.mrf.mxu1 }
 0x219   : > { %v402_v26 = vsel %vm401_vm4, %v346_v25, -inf }
 0x21a   : > { %403 = vmax.xlane.f32.xlu1 %v402_v26  ;;  %v747_v27 = vpop.f32.mrf.mxu1 }
 0x21c   : > { %v349_v28 = vpop.f32.mrf.mxu1  ;;  %v395_v29 = vpop.f32.mrf.mxu0 }
 0x21d   : > { %v405_v30 = vsel %vm401_vm4, %v395_v29, -inf }
 0x21e   : > { %v748_v31 = vpop.f32.mrf.mxu1  ;;  %406 = vmax.xlane.f32.xlu1 %v405_v30  ;;  %v753_v32 = vpop.f32.mrf.mxu0 }
 0x220   : > { %v398_v33 = vpop.f32.mrf.mxu0 }
 0x222   : > { %v754_v34 = vpop.f32.mrf.mxu0 }
 0x2a3   : > { %v404_v35 = vpop.xlane.xlu1 %403 }
 0x2a4   : > { %v408_v36 = vsub.f32 %v346_v25, %v404_v35 }
 0x2a6   : > { %v410_v37 = vmul.f32 1.442695, %v408_v36 }
 0x2a7   : > { %v407_v38 = vpop.xlane.xlu1 %406 }
 0x2a8   : > { %828 = vpow2.f32 %v410_v37  ;;  %v409_v39 = vsub.f32 %v395_v29, %v407_v38 }
 0x2aa   : > { %v412_v40 = vmul.f32 1.442695, %v409_v39 }
 0x2ac   : > { %830 = vpow2.f32 %v412_v40 }
 0x2b5   : > { %v829_v41 = vpop.eup %828 }
 0x2b6   : > { %v414_v42 = vsel %vm401_vm4, %v829_v41, 0.0  ;;  %v420_v43 = vpack.c.bf16 %v829_v41, %v829_v41 }
 0x2b7   : > { %415 = vadd.xlane.f32.xlu0 %v414_v42 }
 0x2b8   : > { %758 = vmatmul.mubr.msk.bf16.vlgmr.msra.gmra.mxu1 %vm401_vm4, %v420_v43 }
 0x2b9   : > { %v831_v44 = vpop.eup %830  ;;  %775 = vmatprep.mubr.msk.bf16.mxu1 %vm890_vm1, %v889_v6  ;;  %768 = vmatpush3.bf16.msra.mxu1 %v824_v47 }
 0x2ba   : > { %v417_v45 = vsel %vm401_vm4, %v831_v44, 0.0  ;;  %v421_v46 = vpack.c.bf16 %v831_v44, %v831_v44  ;;  %769 = vmatprep.subr.bf16.mxu1 %v889_v6 }
 0x2bb   : > { %418 = vadd.xlane.f32.xlu1 %v417_v45 }
 0x2bc   : > { %764 = vmatmul.mubr.msk.bf16.vlgmr.msra.gmra.mxu0 %vm401_vm4, %v421_v46 }
 0x2bd   : > { %770 = vmatpush3.bf16.msra.mxu1 %v825_v48 }
 0x2be   : > { %771 = vmatprep.subr.bf16.mxu1 %v889_v6 }
 0x2c1   : > { %772 = vmatpush3.bf16.msra.mxu1 %v826_v49 }
 0x2c2   : > { %773 = vmatprep.subr.bf16.mxu1 %v889_v6 }
 0x2c5   : > { %774 = vmatpush3.bf16.msra.mxu1 %v827_v50 }
 0x340   : > { %v416_v51 = vpop.xlane.xlu0 %415 }
 0x341   : > { %832 = vrcp.f32 %v416_v51 }
 0x344   : > { %v419_v52 = vpop.xlane.xlu1 %418 }
 0x345   : > { %834 = vrcp.f32 %v419_v52 }
 0x34e   : > { %v833_v55 = vpop.eup %832 }
 0x352   : > { %v835_v56 = vpop.eup %834 }
 0x378   : > { %v465_v53 = vpop.f32.mrf.mxu1 }
 0x379   : > { %v519_v59 = vmul.f32 %v833_v55, %v465_v53 }
 0x37a   : > { %v759_v54 = vpop.f32.mrf.mxu1 }
 0x37c   : > { %v468_v57 = vpop.f32.mrf.mxu1  ;;  %v511_v58 = vpop.f32.mrf.mxu0 }
 0x37d   : > { %v520_v60 = vmul.f32 %v835_v56, %v511_v58 }
 0x37e   : > { %v760_v61 = vpop.f32.mrf.mxu1  ;;  %v765_v62 = vpop.f32.mrf.mxu0 }
 0x37f   : > { %v521_v63 = vpack.c.bf16 %v520_v60, %v519_v59 }
 0x380   : > { %v514_v0 = vpop.f32.mrf.mxu0 }
 0x381   : > { %776 = vmatmul.mubr.msk.bf16.vlgmr.msra.gmra.mxu1 %vm305_vm2, %v521_v63 }
 0x382   : > { %v766_v1 = vpop.f32.mrf.mxu0 }
 0x441   : > { %v591_v2 = vpop.f32.mrf.mxu1 }
 0x443   : > { %v777_v3 = vpop.f32.mrf.mxu1  ;;  %601 = sbr.rel (%p723_p5) target bundleno = 1098 (0x44a), region = 36 }
 0x445   : > { %v594_v4 = vpop.f32.mrf.mxu1 }
 0x447   : > { %v778_v5 = vpop.f32.mrf.mxu1 }
 0x448   : > { %v892_v6 = vmov 0.0  }
 0x449   : > { %602 = vst.msk [vmem:[#allocation2] sm:$0xff] %vm249_vm0, %v892_v6  ;;  %603 = vst.msk [vmem:[#allocation2 + $0x8] sm:$0xff] %vm249_vm0, %v892_v6 }
 0x44a PF: > { %p989_p6 = scmp.eq.s32.totalorder %s699_s15, 7  ;;  %s893_s29 = smov [#allocation2]  }
 0x44b   : > { %s619_s30 = sshll.u32 %s893_s29, 4  ;;  %s620_s30 = int_to_ptr.vmem [resolvable:$true] %s619_s30 }
 0x44c   : > { %s836_s4 = scalar_lea.vmem %s620_s30, 256  ;;  %p843_p10 = scmp.lt.s32.totalorder %s620_s30, %s620_s30 }
 0x44d   : > { %p837_p7 = scmp.ne.s32.totalorder %s620_s30, %s836_s4  ;;  %p844_p11 = scmp.lt.s32.totalorder %s836_s4, %s836_s4 }
 0x44f   : > { %p838_p8 = pnand %p837_p7, %p989_p6  ;;  %p845_p12 = por %p844_p11, %p843_p10 }
 0x450   : > { %v604_v7 = vld [vmem:[#allocation2] sm:$0xff]  ;;  %v605_v8 = vld [vmem:[#allocation2 + $0x8] sm:$0xff] }
 0x451   : > { %v606_v9 = vadd.f32 %v604_v7, %v591_v2  ;;  %v607_v10 = vadd.f32 %v605_v8, %v594_v4  ;;  %p839_p9 = pneg %p838_p8 }
 0x453   : > { %608 = vst.msk [vmem:[#allocation2] sm:$0xff] %vm249_vm0, %v606_v9  ;;  %609 = vst.msk [vmem:[#allocation2 + $0x8] sm:$0xff] %vm249_vm0, %v607_v10  ;;  %p846_p13 = pnand %p845_p12, %p839_p9 }
 0x455   : > { %849 = shalt.err (!%p846_p13)
}
 0x456   : > { %s894_s5 = smov 128   ;;  %s895_s6 = smov 8  }
 0x457   : > { %780 = dma.vmem_to_hbm [thread:$0]  (%p989_p6), %s620_s30, 256, %s1018_s3, [#allocation3], %s894_s5, %s894_s5, %s895_s6  }
 0x458   : > { %873 = dma.done.wait (%p989_p6), [#allocation3], 256  }
 0x459   : > { %875 = vsyncadd (%p989_p6), [#allocation3], 4294967040 }
 0x45a PF: > { %s14_s14 = sadd.s32 1, %s886_s14   ;;  %s1020_s12 = smov %s882_s13 }
 0x45b   : > { %p11_p0 = scmp.ge.s32.totalorder %s14_s14, 10   ;;  %s1021_s13 = smov %s1023_s16 }
 0x45d   :  { %13 = sbr.rel (!%p11_p0) target bundleno = 2 (0x2), region = 70 }
 0x462   :  { %635 = vsyncpa [#allocation3], 1 }
 0x463   :  { %637 = vsyncpa [#allocation3 + $0x1], 1 }

</bundles_post_ra>
